<compile_context>
chip_gen: v5e
topology: v5e:2x2
jax: 0.10.0
libtpu: 0.0.40
codegen_flags: <defaults>
</compile_context>

<pallas_src>
import jax
import jax.numpy as jnp
from jax.experimental import pallas as pl
from jax.experimental.pallas import tpu as pltpu


# ----------------------------------------------------------------------------
# Pallas kernels
# ----------------------------------------------------------------------------
def _make_conv_kernel(stride, ho, wo, do_norm, do_act):
    """Fused Conv2d(3x3, valid) + InstanceNorm2d(affine) + LeakyReLU.

    Per grid step (one sample, one Cout tile):
      x_ref : (stride, hp*wo, 3*Cin) bf16  row-phase-split input, column taps
                                           packed into the lane dim
      w_ref : (3, 3*Cin, TC)         bf16  one (3*Cin, TC) matrix per row tap
      b_ref : (1, TC)                f32
      g_ref, be_ref : (1, TC)        f32   (only when do_norm)
      o_ref : (ho*wo, TC)            f32
    The three row taps are contiguous slices of the flattened (row, col) axis,
    so the conv is 3 accumulated MXU matmuls with no HBM im2col tensor.
    """
    p_len = ho * wo
    neg_slope = 0.01   # nn.LeakyReLU() default in the reference module
    eps = 1e-5         # nn.InstanceNorm2d default

    def kernel(x_ref, w_ref, b_ref, *rest):
        if do_norm:
            g_ref, be_ref, o_ref = rest
        else:
            (o_ref,) = rest

        acc = jnp.zeros((p_len, o_ref.shape[-1]), jnp.float32)
        for dy in range(3):
            phase = dy % stride
            off = (dy // stride) * wo
            tap = x_ref[phase, off:off + p_len, :]           # (p_len, 3*Cin)
            acc = acc + jnp.dot(tap, w_ref[dy],
                                preferred_element_type=jnp.float32)
        y = acc + b_ref[...]

        if do_norm:
            # single-pass per-(sample, channel) stats over all spatial rows
            mean = jnp.mean(y, axis=0, keepdims=True)
            mean_sq = jnp.mean(y * y, axis=0, keepdims=True)
            var = mean_sq - mean * mean
            y = (y - mean) * jax.lax.rsqrt(var + eps)
            y = y * g_ref[...] + be_ref[...]
        if do_act:
            y = jnp.where(y > 0, y, neg_slope * y)
        o_ref[...] = y.astype(o_ref.dtype)

    return kernel


def _make_pool_kernel(ho, wo):
    """AvgPool2d(3, stride=2, pad=1, count_include_pad=False), fused windows.

      xph_ref : (4, hp, wp, C) f32  2x2 phase-split of the zero-padded input
      inv_ref : (ho, wo, 1)    f32  1 / (# valid, non-pad taps per window)
      o_ref   : (ho, wo, C)    f32
    """

    def kernel(xph_ref, inv_ref, o_ref):
        c = o_ref.shape[-1]
        acc = jnp.zeros((ho, wo, c), jnp.float32)
        for dy in range(3):
            for dx in range(3):
                p = (dy % 2) * 2 + (dx % 2)
                r0, c0 = dy // 2, dx // 2
                acc = acc + xph_ref[p, r0:r0 + ho, c0:c0 + wo, :]
        o_ref[...] = (acc * inv_ref[...]).astype(o_ref.dtype)

    return kernel


# ----------------------------------------------------------------------------
# Plain-JAX glue: cheap layout prep (no 9x inflation)
# ----------------------------------------------------------------------------
def _conv_geometry(h, w, stride):
    ho = (h - 3) // stride + 1
    wo = (w - 3) // stride + 1
    hp = h if stride == 1 else ho + 1     # rows per row-phase seen by kernel
    return ho, wo, hp


def _build_conv_rows(x, stride, ho, wo, hp):
    """(N,H,W,C) -> (N, stride, hp*wo, 3*C) bf16 partial-im2col rows.

    Column taps (dx=0..2) are concatenated into the channel dim; for stride 2
    the rows are split into even/odd phases so the kernel's row taps become
    contiguous slices of the flattened (row, col) axis.
    """
    n, h, w, c = x.shape
    cols = [x[:, :, dx::stride, :][:, :, :wo, :] for dx in range(3)]
    xc = jnp.concatenate(cols, axis=-1)                      # (N, H, wo, 3C)
    if stride == 1:
        ph = xc[:, None]                                     # hp == H
    else:
        need_h = 2 * hp
        if need_h > h:                                       # odd H: 1 zero row
            xc = jnp.pad(xc, ((0, 0), (0, need_h - h), (0, 0), (0, 0)))
        ph = jnp.stack([xc[:, p::2][:, :hp] for p in range(2)], axis=1)
    return ph.reshape(n, stride, hp * wo, 3 * c).astype(jnp.bfloat16)


# ----------------------------------------------------------------------------
# Layer wrappers calling pallas_call
# ----------------------------------------------------------------------------
def conv_in_lrelu(x, params, stride, do_norm, do_act):
    n, h, w_sp, cin = x.shape
    ho, wo, hp = _conv_geometry(h, w_sp, stride)
    xrows = _build_conv_rows(x, stride, ho, wo, hp)
    p_len = ho * wo
    k3 = 3 * cin

    wt = params["w"].astype(jnp.bfloat16).reshape(3, k3, -1)  # (3, 3*Cin, Cout)
    cout = wt.shape[-1]
    b = params["b"].reshape(1, cout).astype(jnp.float32)

    # Lane-pad the tiny 1-channel head to 128 (full-lane stores); pad wide
    # Cout up to a multiple of the 128-wide channel tile if needed.
    if cout < 8:
        cout_p = 128
    elif cout > 128 and cout % 128:
        cout_p = ((cout + 127) // 128) * 128
    else:
        cout_p = cout
    if cout_p != cout:
        wt = jnp.pad(wt, ((0, 0), (0, 0), (0, cout_p - cout)))
        b = jnp.pad(b, ((0, 0), (0, cout_p - cout)))
    tc = min(cout_p, 128)
    n_ct = cout_p // tc

    in_specs = [
        pl.BlockSpec((None, stride, hp * wo, k3), lambda i, j: (i, 0, 0, 0)),
        pl.BlockSpec((3, k3, tc), lambda i, j: (0, 0, j)),
        pl.BlockSpec((1, tc), lambda i, j: (0, j)),
    ]
    args = [xrows, wt, b]
    if do_norm:
        g = params["gamma"].reshape(1, cout).astype(jnp.float32)
        be = params["beta"].reshape(1, cout).astype(jnp.float32)
        if cout_p != cout:
            g = jnp.pad(g, ((0, 0), (0, cout_p - cout)))
            be = jnp.pad(be, ((0, 0), (0, cout_p - cout)))
        in_specs += [pl.BlockSpec((1, tc), lambda i, j: (0, j)),
                     pl.BlockSpec((1, tc), lambda i, j: (0, j))]
        args += [g, be]

    out = pl.pallas_call(
        _make_conv_kernel(stride, ho, wo, do_norm, do_act),
        out_shape=jax.ShapeDtypeStruct((n, p_len, cout_p), jnp.float32),
        grid=(n, n_ct),
        in_specs=in_specs,
        out_specs=pl.BlockSpec((None, p_len, tc), lambda i, j: (i, 0, j)),
        compiler_params=pltpu.CompilerParams(
            dimension_semantics=("parallel", "parallel")),
    )(*args)

    if cout_p != cout:
        out = out[:, :, :cout]
    return out.reshape(n, ho, wo, cout)


def avg_pool_down(x):
    """AvgPool2d(3, stride=2, padding=1, count_include_pad=False) on NHWC."""
    n, h, w, c = x.shape
    ho = (h - 1) // 2 + 1
    wo = (w - 1) // 2 + 1
    hp, wp = ho + 1, wo + 1
    pad_h = 2 * hp - h - 1
    pad_w = 2 * wp - w - 1

    xpad = jnp.pad(x, ((0, 0), (1, pad_h), (1, pad_w), (0, 0)))
    xph = jnp.stack([xpad[:, py::2, px::2, :][:, :hp, :wp, :]
                     for py in range(2) for px in range(2)], axis=1)

    # Divisor for count_include_pad=False (geometry only).
    mpad = jnp.pad(jnp.ones((h, w), jnp.float32), ((1, pad_h), (1, pad_w)))
    mph = jnp.stack([mpad[py::2, px::2][:hp, :wp]
                     for py in range(2) for px in range(2)], axis=0)
    cnt = sum(mph[(dy % 2) * 2 + (dx % 2),
                  dy // 2:dy // 2 + ho, dx // 2:dx // 2 + wo]
              for dy in range(3) for dx in range(3))
    inv = (1.0 / cnt)[:, :, None]                            # (ho, wo, 1)

    out = pl.pallas_call(
        _make_pool_kernel(ho, wo),
        out_shape=jax.ShapeDtypeStruct((n, ho, wo, c), jnp.float32),
        grid=(n,),
        in_specs=[
            pl.BlockSpec((None, 4, hp, wp, c), lambda i: (i, 0, 0, 0, 0)),
            pl.BlockSpec((ho, wo, 1), lambda i: (0, 0, 0)),
        ],
        out_specs=pl.BlockSpec((None, ho, wo, c), lambda i: (i, 0, 0, 0)),
        compiler_params=pltpu.CompilerParams(dimension_semantics=("parallel",)),
    )(xph, inv)
    return out


# ----------------------------------------------------------------------------
# Parameter construction (deterministic, synthetic)
# ----------------------------------------------------------------------------
def _single_scale_layer_cfgs(input_nc, ndf, n_layer):
    """Replicates SingleScaleDiscriminator.__init__ layer structure."""
    cfgs = []
    nf = ndf
    cfgs.append(dict(cin=input_nc, cout=nf, stride=2, norm=True, act=True))
    for _ in range(1, n_layer):
        nf_prev, nf = nf, min(nf * 2, 512)
        cfgs.append(dict(cin=nf_prev, cout=nf, stride=2, norm=True, act=True))
    nf_prev, nf = nf, min(nf * 2, 512)
    cfgs.append(dict(cin=nf_prev, cout=nf, stride=1, norm=True, act=True))
    cfgs.append(dict(cin=nf, cout=1, stride=1, norm=False, act=False))
    return cfgs


def init_multiscale_params(key, input_nc, num_D, n_layer, ndf):
    ndf_max = 64
    all_scales = []
    for i in range(num_D):
        ndf_i = min(ndf_max, ndf * 2 ** (num_D - 1 - i))
        cfgs = _single_scale_layer_cfgs(input_nc, ndf_i, n_layer)
        layers = []
        for cfg in cfgs:
            key, kw, kb = jax.random.split(key, 3)
            w = 0.05 * jax.random.normal(
                kw, (3, 3, cfg["cin"], cfg["cout"]), jnp.float32)
            b = 0.05 * jax.random.normal(kb, (cfg["cout"],), jnp.float32)
            gamma = jnp.ones((cfg["cout"],), jnp.float32)   # IN affine default
            beta = jnp.zeros((cfg["cout"],), jnp.float32)
            layers.append(dict(w=w, b=b, gamma=gamma, beta=beta,
                               stride=cfg["stride"], norm=cfg["norm"],
                               act=cfg["act"]))
        all_scales.append(layers)
    return all_scales


# ----------------------------------------------------------------------------
# MultiScaleDiscriminator forward
# ----------------------------------------------------------------------------
def multiscale_discriminator_forward(x, params, num_D):
    """Returns list (len num_D) of lists of intermediate features (NHWC)."""
    result = []
    x_down = x
    for i in range(num_D):
        scale_layers = params[num_D - 1 - i]
        feats = []
        h = x_down
        for lp in scale_layers:
            h = conv_in_lrelu(h, lp, lp["stride"], lp["norm"], lp["act"])
            feats.append(h)
        result.append(feats)
        if i != num_D - 1:
            x_down = avg_pool_down(x_down)
    return result


# ----------------------------------------------------------------------------
if __name__ == "__main__":
    INPUT_NC = 3
    NUM_D = 2
    N_LAYER = 1
    NDF = 16
    # padding_mode unused: Conv2d layers have padding=0 in the reference.

    N, H, W = 2, 24, 24  # NHWC input == PyTorch NCHW (2, 3, 24, 24)

    key = jax.random.PRNGKey(0)
    key, kx = jax.random.split(key)
    x = jax.random.normal(kx, (N, H, W, INPUT_NC), jnp.float32)

    params = init_multiscale_params(key, INPUT_NC, NUM_D, N_LAYER, NDF)

    result = multiscale_discriminator_forward(x, params, NUM_D)
    result = jax.block_until_ready(result)

    # sanity: num_D scales, each with n_layer + 2 feature maps, final 1-channel
    assert len(result) == NUM_D
    for feats in result:
        assert len(feats) == N_LAYER + 2
        assert feats[-1].shape[-1] == 1
        for f in feats:
            assert bool(jnp.isfinite(f).all())

    print("KERNEL_OK")
</pallas_src>

<mosaic_0001>
module attributes {stable_mosaic.version = 11 : i64} {
  func.func @kernel(%arg0: i32, %arg1: i32, %arg2: memref<1x2x132x9xbf16, #tpu.memory_space<vmem>>, %arg3: memref<3x9x16xbf16, #tpu.memory_space<vmem>>, %arg4: memref<1x16xf32, #tpu.memory_space<vmem>>, %arg5: memref<1x16xf32, #tpu.memory_space<vmem>>, %arg6: memref<1x16xf32, #tpu.memory_space<vmem>>, %arg7: memref<1x121x16xf32, #tpu.memory_space<vmem>>) attributes {dimension_semantics = [#tpu.dimension_semantics<parallel>, #tpu.dimension_semantics<parallel>], iteration_bounds = array<i64: 2, 1>, scalar_prefetch = 0 : i64, scratch_operands = 0 : i64, tpu.core_type = #tpu.core_type<tc>, window_params = [{transform_indices = @transform_0, window_bounds = array<i64: 1, 2, 132, 9>}, {transform_indices = @transform_1, window_bounds = array<i64: 3, 9, 16>}, {transform_indices = @transform_2, window_bounds = array<i64: 1, 16>}, {transform_indices = @transform_3, window_bounds = array<i64: 1, 16>}, {transform_indices = @transform_4, window_bounds = array<i64: 1, 16>}, {transform_indices = @transform_5, window_bounds = array<i64: 1, 121, 16>}]} {
    %cst = arith.constant 0.000000e+00 : f32
    %0 = vector.broadcast %cst : f32 to vector<121x16xf32>
    %c0 = arith.constant 0 : index
    %c0_0 = arith.constant 0 : index
    %c0_1 = arith.constant 0 : index
    %c0_2 = arith.constant 0 : index
    %1 = vector.load %arg2[%c0, %c0_0, %c0_1, %c0_2] : memref<1x2x132x9xbf16, #tpu.memory_space<vmem>>, vector<1x1x121x9xbf16>
    %2 = vector.shape_cast %1 : vector<1x1x121x9xbf16> to vector<121x9xbf16>
    %c0_3 = arith.constant 0 : index
    %c0_4 = arith.constant 0 : index
    %c0_5 = arith.constant 0 : index
    %3 = vector.load %arg3[%c0_3, %c0_4, %c0_5] : memref<3x9x16xbf16, #tpu.memory_space<vmem>>, vector<1x9x16xbf16>
    %4 = vector.shape_cast %3 : vector<1x9x16xbf16> to vector<9x16xbf16>
    %cst_6 = arith.constant dense<0.000000e+00> : vector<121x16xf32>
    %5 = tpu.matmul %2, %4, %cst_6 {dimension_numbers = #tpu.dot_dimension_numbers<[1], [0], [0], [1], [0, 0, 1, 1], [], []>} : vector<121x9xbf16>, vector<9x16xbf16>, vector<121x16xf32> -> vector<121x16xf32>
    %6 = arith.addf %0, %5 : vector<121x16xf32>
    %c0_7 = arith.constant 0 : index
    %c1 = arith.constant 1 : index
    %c0_8 = arith.constant 0 : index
    %c0_9 = arith.constant 0 : index
    %7 = vector.load %arg2[%c0_7, %c1, %c0_8, %c0_9] : memref<1x2x132x9xbf16, #tpu.memory_space<vmem>>, vector<1x1x121x9xbf16>
    %8 = vector.shape_cast %7 : vector<1x1x121x9xbf16> to vector<121x9xbf16>
    %c1_10 = arith.constant 1 : index
    %c0_11 = arith.constant 0 : index
    %c0_12 = arith.constant 0 : index
    %9 = vector.load %arg3[%c1_10, %c0_11, %c0_12] : memref<3x9x16xbf16, #tpu.memory_space<vmem>>, vector<1x9x16xbf16>
    %10 = vector.shape_cast %9 : vector<1x9x16xbf16> to vector<9x16xbf16>
    %cst_13 = arith.constant dense<0.000000e+00> : vector<121x16xf32>
    %11 = tpu.matmul %8, %10, %cst_13 {dimension_numbers = #tpu.dot_dimension_numbers<[1], [0], [0], [1], [0, 0, 1, 1], [], []>} : vector<121x9xbf16>, vector<9x16xbf16>, vector<121x16xf32> -> vector<121x16xf32>
    %12 = arith.addf %6, %11 : vector<121x16xf32>
    %c0_14 = arith.constant 0 : index
    %c0_15 = arith.constant 0 : index
    %c11 = arith.constant 11 : index
    %c0_16 = arith.constant 0 : index
    %13 = vector.load %arg2[%c0_14, %c0_15, %c11, %c0_16] : memref<1x2x132x9xbf16, #tpu.memory_space<vmem>>, vector<1x1x121x9xbf16>
    %14 = vector.shape_cast %13 : vector<1x1x121x9xbf16> to vector<121x9xbf16>
    %c2 = arith.constant 2 : index
    %c0_17 = arith.constant 0 : index
    %c0_18 = arith.constant 0 : index
    %15 = vector.load %arg3[%c2, %c0_17, %c0_18] : memref<3x9x16xbf16, #tpu.memory_space<vmem>>, vector<1x9x16xbf16>
    %16 = vector.shape_cast %15 : vector<1x9x16xbf16> to vector<9x16xbf16>
    %cst_19 = arith.constant dense<0.000000e+00> : vector<121x16xf32>
    %17 = tpu.matmul %14, %16, %cst_19 {dimension_numbers = #tpu.dot_dimension_numbers<[1], [0], [0], [1], [0, 0, 1, 1], [], []>} : vector<121x9xbf16>, vector<9x16xbf16>, vector<121x16xf32> -> vector<121x16xf32>
    %18 = arith.addf %12, %17 : vector<121x16xf32>
    %c0_20 = arith.constant 0 : index
    %c0_21 = arith.constant 0 : index
    %19 = vector.load %arg4[%c0_20, %c0_21] : memref<1x16xf32, #tpu.memory_space<vmem>>, vector<1x16xf32>
    %20 = vector.broadcast %19 : vector<1x16xf32> to vector<121x16xf32>
    %21 = arith.addf %18, %20 : vector<121x16xf32>
    %cst_22 = arith.constant dense<0.000000e+00> : vector<16xf32>
    %22 = vector.multi_reduction <add>, %21, %cst_22 [0] : vector<121x16xf32> to vector<16xf32>
    %23 = vector.shape_cast %22 : vector<16xf32> to vector<1x16xf32>
    %cst_23 = arith.constant 1.210000e+02 : f32
    %24 = vector.broadcast %cst_23 : f32 to vector<1x16xf32>
    %25 = arith.divf %23, %24 : vector<1x16xf32>
    %26 = arith.mulf %21, %21 : vector<121x16xf32>
    %cst_24 = arith.constant dense<0.000000e+00> : vector<16xf32>
    %27 = vector.multi_reduction <add>, %26, %cst_24 [0] : vector<121x16xf32> to vector<16xf32>
    %28 = vector.shape_cast %27 : vector<16xf32> to vector<1x16xf32>
    %cst_25 = arith.constant 1.210000e+02 : f32
    %29 = vector.broadcast %cst_25 : f32 to vector<1x16xf32>
    %30 = arith.divf %28, %29 : vector<1x16xf32>
    %31 = arith.mulf %25, %25 : vector<1x16xf32>
    %32 = arith.subf %30, %31 : vector<1x16xf32>
    %33 = vector.broadcast %25 : vector<1x16xf32> to vector<121x16xf32>
    %34 = arith.subf %21, %33 : vector<121x16xf32>
    %cst_26 = arith.constant 9.99999974E-6 : f32
    %35 = vector.broadcast %cst_26 : f32 to vector<1x16xf32>
    %36 = arith.addf %32, %35 : vector<1x16xf32>
    %37 = math.rsqrt %36 : vector<1x16xf32>
    %38 = vector.broadcast %37 : vector<1x16xf32> to vector<121x16xf32>
    %39 = arith.mulf %34, %38 : vector<121x16xf32>
    %c0_27 = arith.constant 0 : index
    %c0_28 = arith.constant 0 : index
    %40 = vector.load %arg5[%c0_27, %c0_28] : memref<1x16xf32, #tpu.memory_space<vmem>>, vector<1x16xf32>
    %41 = vector.broadcast %40 : vector<1x16xf32> to vector<121x16xf32>
    %42 = arith.mulf %39, %41 : vector<121x16xf32>
    %c0_29 = arith.constant 0 : index
    %c0_30 = arith.constant 0 : index
    %43 = vector.load %arg6[%c0_29, %c0_30] : memref<1x16xf32, #tpu.memory_space<vmem>>, vector<1x16xf32>
    %44 = vector.broadcast %43 : vector<1x16xf32> to vector<121x16xf32>
    %45 = arith.addf %42, %44 : vector<121x16xf32>
    %cst_31 = arith.constant 0.000000e+00 : f32
    %46 = vector.broadcast %cst_31 : f32 to vector<121x16xf32>
    %47 = arith.cmpf ogt, %45, %46 : vector<121x16xf32>
    %cst_32 = arith.constant 0.00999999977 : f32
    %48 = vector.broadcast %cst_32 : f32 to vector<121x16xf32>
    %49 = arith.mulf %48, %45 : vector<121x16xf32>
    %50 = arith.select %47, %45, %49 : vector<121x16xi1>, vector<121x16xf32>
    %c0_33 = arith.constant 0 : index
    %c0_34 = arith.constant 0 : index
    %c0_35 = arith.constant 0 : index
    %51 = vector.load %arg7[%c0_33, %c0_34, %c0_35] : memref<1x121x16xf32, #tpu.memory_space<vmem>>, vector<1x121x16xf32>
    %52 = vector.shape_cast %51 : vector<1x121x16xf32> to vector<121x16xf32>
    %53 = vector.shape_cast %50 : vector<121x16xf32> to vector<1x121x16xf32>
    tpu.vector_store %arg7[%c0_33, %c0_34, %c0_35], %53 {strides = array<i32>} : memref<1x121x16xf32, #tpu.memory_space<vmem>>, vector<1x121x16xf32>,
    return
  }
  func.func @transform_0(%arg0: i32, %arg1: i32) -> (i32, i32, i32, i32) {
    %c0_i32 = arith.constant 0 : i32
    %c0_i32_0 = arith.constant 0 : i32
    %c0_i32_1 = arith.constant 0 : i32
    %c0_i32_2 = arith.constant 0 : i32
    return %arg0, %c0_i32, %c0_i32_0, %c0_i32_1 : i32, i32, i32, i32
  }
  func.func @transform_1(%arg0: i32, %arg1: i32) -> (i32, i32, i32) {
    %c0_i32 = arith.constant 0 : i32
    %c0_i32_0 = arith.constant 0 : i32
    %c0_i32_1 = arith.constant 0 : i32
    return %c0_i32, %c0_i32_0, %arg1 : i32, i32, i32
  }
  func.func @transform_2(%arg0: i32, %arg1: i32) -> (i32, i32) {
    %c0_i32 = arith.constant 0 : i32
    %c0_i32_0 = arith.constant 0 : i32
    return %c0_i32, %arg1 : i32, i32
  }
  func.func @transform_3(%arg0: i32, %arg1: i32) -> (i32, i32) {
    %c0_i32 = arith.constant 0 : i32
    %c0_i32_0 = arith.constant 0 : i32
    return %c0_i32, %arg1 : i32, i32
  }
  func.func @transform_4(%arg0: i32, %arg1: i32) -> (i32, i32) {
    %c0_i32 = arith.constant 0 : i32
    %c0_i32_0 = arith.constant 0 : i32
    return %c0_i32, %arg1 : i32, i32
  }
  func.func @transform_5(%arg0: i32, %arg1: i32) -> (i32, i32, i32) {
    %c0_i32 = arith.constant 0 : i32
    %c0_i32_0 = arith.constant 0 : i32
    return %arg0, %c0_i32, %arg1 : i32, i32, i32
  }
}

</mosaic_0001>

<bundles_post_ra>
// kernel: tpu_custom_call.1
= control target key start
LH: loop header
LB: loop body
LE: loop exit
PB: predicated region body
PF: predicated region fallthrough
CT: control target
= control target key end

     0   :  { %s1504_s18 = smov 0   ;;  %s1506_s19 = smov 0   ;;  %s1862_s0 = inlined_call_operand.vmem [shape: bf16[2,2,132,9], index: 0, kind: input, shape index: {}]   ;;  %s1863_s1 = inlined_call_operand.vmem [shape: bf16[3,9,16], index: 1, kind: input, shape index: {}]   ;;  %s1864_s2 = inlined_call_operand.vmem [shape: f32[1,16], index: 2, kind: input, shape index: {}]   ;;  %s1865_s3 = inlined_call_operand.vmem [shape: f32[1,16], index: 3, kind: input, shape index: {}]   ;;  %s1866_s4 = inlined_call_operand.vmem [shape: f32[1,16], index: 4, kind: input, shape index: {}]   ;;  %s1867_s5 = inlined_call_operand.vmem [shape: f32[2,121,16], index: 5, kind: output, shape index: {}]  }
   0x1   :  { %s1508_s20 = smov 0  }
   0x2 LB: > { %s27_s21 = sadd.s32 1, %s1466_s19  ;;  %p1225_p0 = scmp.ge.s32.totalorder %s1470_s20, 1  ;;  %s1470_s20 = sphi %s1508_s20, %s15_s20   ;;  %s1466_s19 = sphi %s1506_s19, %s1869_s19   ;;  %s1462_s18 = sphi %s1504_s18, %s1868_s18  }
   0x3   : > { %p29_p1 = scmp.ge.s32.totalorder %s27_s21, 2  ;;  %p234_p2 = scmp.lt.s32.totalorder %s1470_s20, 3 }
   0x5   : > { %s1871_s21 = smov (%p29_p1, %s27_s21), 0  ;;  %p235_p3 = pnand %p1225_p0, %p234_p2 }
   0x6   : > { %p278_p4 = scmp.lt.s32.totalorder (!%p235_p3), %s1462_s18, 1 }
   0x7   : > { %238 = sbr.rel (%p235_p3) target bundleno = 331 (0x14b), region = 40 }
   0xc   : > { %v1281_v0 = vld [vmem:[%s1863_s1 + $0x8] sm:$0xf]  ;;  %v1401_v1 = vld [vmem:[%s1863_s1 + $0x8] sm:$0x10]  ;;  %vm413_vm0 = vcmask 1043456   ;;  %vm414_vm1 = vcmask 1044480  }
   0xd   : > { %v1282_v2 = vor.u32 %v1401_v1, %v1281_v0  ;;  %v1325_v3 = vld [vmem:[%s1863_s1] sm:$0xf]  ;;  %v1472_v4 = vmov 65535   ;;  %v1392_v6 = vld [vmem:[%s1863_s1] sm:$0x10]  ;;  %s1873_s18 = smov (!%p278_p4, %s1462_s18), 1 }
   0xe   : > { %v415_v5 = vsel %vm413_vm0, 4294967295, %v1472_v4  ;;  %v1371_v7 = vld [vmem:[%s1863_s1 + $0x10] sm:$0xf]  ;;  %v1326_v9 = vor.u32 %v1392_v6, %v1325_v3  ;;  %v1410_v10 = vld [vmem:[%s1863_s1 + $0x10] sm:$0x10]  ;;  %s1414_s9 = smul.u32 136, %s1873_s18 }
   0xf   : > { %v416_v8 = vsel %vm414_vm1, %v415_v5, 0  ;;  %v1372_v12 = vor.u32 %v1410_v10, %v1371_v7  ;;  %vm388_vm2 = vcmask 72704   ;;  %vm649_vm3 = vsmask.f32 6400  ;;  %s1383_s23 = sshll.u32 %s1873_s18, 7 }
  0x10   : > { %v418_v11 = vand.u32 %v1282_v2, %v416_v8  ;;  %v539_v13 = vand.u32 %v1326_v9, %v416_v8  ;;  %s1546_s12 = scalar_lea.vmem %s1862_s0, %s1414_s9  ;;  %vm838_vm4 = vcmask 130048   ;;  %vm868_vm5 = vcmask 122880   ;;  %s1806_s26 = scalar_lea.vmem %s1867_s5, %s1383_s23 }
  0x11   : > { %v751_v14 = vand.u32 %v1372_v12, %v416_v8  ;;  %v1399_v15 = vld [vmem:[%s1546_s12 + $0x74] sm:$0xff]  ;;  %v1393_v16 = vld [vmem:[%s1546_s12 + $0x44] sm:$0xff]  ;;  %v1403_v20 = vld [vmem:[%s1546_s12 + $0xc] sm:$0xff] }
  0x12   : > { %1411 = vmatpush.bf16.msra.mxu3 %v418_v11  ;;  %427 = vmatpush.bf16.msra.mxu0 %v418_v11  ;;  %v1384_v17 = vld [vmem:[%s1546_s12] sm:$0xff]  ;;  %v1402_v19 = vld [vmem:[%s1546_s12 + $0x4] sm:$0xf0]  ;;  %v659_v22 = vshrl.u32 %v1403_v20, 16  ;;  %v662_v23 = vshll.u32 %v1403_v20, 16  ;;  %v1404_v32 = vld [vmem:[%s1546_s12 + $0x14] sm:$0xff] }
  0x13   : > { %548 = vmatpush.bf16.msra.mxu1 %v539_v13  ;;  %760 = vmatpush.bf16.msra.mxu2 %v751_v14  ;;  %v1339_v18 = vld [vmem:[%s1546_s12 + $0x4] sm:$0xe]  ;;  %v1277_v34 = vld [vmem:[%s1546_s12 + $0x7c] sm:$0xf]  ;;  %v1400_v35 = vld [vmem:[%s1546_s12 + $0x7c] sm:$0x10] }
  0x14   : > { %v1340_v21 = vor.u32 %v1402_v19, %v1339_v18  ;;  %v661_v26 = vrot.slane %v659_v22, 1  ;;  %v664_v27 = vrot.slane %v662_v23, 2  ;;  %v668_v36 = vshrl.u32 %v1404_v32, 16  ;;  %v1394_v39 = vld [vmem:[%s1546_s12 + $0x4c] sm:$0xff]  ;;  %v1405_v44 = vld [vmem:[%s1546_s12 + $0x1c] sm:$0xff]  ;;  %v1406_v48 = vld [vmem:[%s1546_s12 + $0x24] sm:$0xff] }
  0x15   : > { %1289 = vmatmul.msk.bf16.vlgmr.msra.gmra.mxu3 %vm388_vm2, %v1399_v15  ;;  %1283 = vmatmul.msk.bf16.vlgmr.msra.gmra.mxu0 %vm388_vm2, %v1393_v16  ;;  %v671_v37 = vshll.u32 %v1404_v32, 16  ;;  %v1278_v38 = vor.u32 %v1400_v35, %v1277_v34  ;;  %v1385_v40 = vld [vmem:[%s1546_s12 + $0x8] sm:$0xff]  ;;  %v677_v46 = vshrl.u32 %v1405_v44, 16  ;;  %v680_v47 = vshll.u32 %v1405_v44, 16  ;;  %v1390_v49 = vld [vmem:[%s1546_s12 + $0x30] sm:$0xff]  ;;  %v1387_v15 = vld [vmem:[%s1546_s12 + $0x18] sm:$0xff] }
  0x16   : > { %1412 = vmatpush.bf16.msrb.mxu3 %v539_v13  ;;  %1327 = vmatmul.msk.bf16.vlgmr.msra.gmra.mxu1 %vm388_vm2, %v1384_v17  ;;  %v651_v24 = vshrl.u32 %v1340_v21, 16  ;;  %v654_v25 = vshll.u32 %v1340_v21, 16  ;;  %v665_v30 = vor.u32 %v664_v27, %v661_v26  ;;  %v670_v41 = vrot.slane %v668_v36, 1  ;;  %v1395_v50 = vld [vmem:[%s1546_s12 + $0x54] sm:$0xff]  ;;  %v1407_v56 = vld [vmem:[%s1546_s12 + $0x2c] sm:$0xff]  ;;  %v1388_v27 = vld [vmem:[%s1546_s12 + $0x20] sm:$0xff] }
  0x17   : > { %v673_v42 = vrot.slane %v671_v37, 2  ;;  %v1386_v51 = vld [vmem:[%s1546_s12 + $0x10] sm:$0xff]  ;;  %v679_v52 = vrot.slane %v677_v46, 1  ;;  %v682_v53 = vrot.slane %v680_v47, 2  ;;  %v686_v54 = vshrl.u32 %v1406_v48, 16 }
  0x18   : > { %v653_v28 = vrot.slane %v651_v24, 1  ;;  %v656_v29 = vrot.slane %v654_v25, 2  ;;  %v689_v55 = vshll.u32 %v1406_v48, 16  ;;  %v695_v60 = vshrl.u32 %v1407_v56, 16  ;;  %v1408_v62 = vld [vmem:[%s1546_s12 + $0x34] sm:$0xff]  ;;  %v1397_v25 = vld [vmem:[%s1546_s12 + $0x64] sm:$0xff] }
  0x19   : > { %v674_v43 = vor.u32 %v673_v42, %v670_v41  ;;  %v683_v57 = vor.u32 %v682_v53, %v679_v52  ;;  %v688_v58 = vrot.slane %v686_v54, 1  ;;  %v698_v61 = vshll.u32 %v1407_v56, 16  ;;  %v1321_v7 = vld [vmem:[%s1546_s12 + $0x38] sm:$0xf]  ;;  %v1391_v8 = vld [vmem:[%s1546_s12 + $0x38] sm:$0x10] }
  0x1a   : > { %1413 = vmatpush.bf16.msra.mxu3 %v751_v14  ;;  %v657_v31 = vor.u32 %v656_v29, %v653_v28  ;;  %v691_v59 = vrot.slane %v689_v55, 2  ;;  %v697_v63 = vrot.slane %v695_v60, 1  ;;  %v704_v4 = vshrl.u32 %v1408_v62, 16  ;;  %v1367_v9 = vld [vmem:[%s1546_s12 + $0x3c] sm:$0xf]  ;;  %v1398_v28 = vld [vmem:[%s1546_s12 + $0x6c] sm:$0xff] }
  0x1b   : > { %v675_v45 = vsel %vm649_vm3, %v665_v30, %v674_v43  ;;  %v700_v0 = vrot.slane %v698_v61, 2  ;;  %v684_v1 = vsel %vm649_vm3, %v674_v43, %v683_v57  ;;  %v707_v5 = vshll.u32 %v1408_v62, 16  ;;  %v1409_v10 = vld [vmem:[%s1546_s12 + $0x3c] sm:$0x30]  ;;  %v1389_v29 = vld [vmem:[%s1546_s12 + $0x28] sm:$0xff] }
  0x1c   : > { %v666_v33 = vsel %vm649_vm3, %v657_v31, %v665_v30  ;;  %v692_v2 = vor.u32 %v691_v59, %v688_v58  ;;  %v706_v11 = vrot.slane %v704_v4, 1  ;;  %v1322_v13 = vor.u32 %v1391_v8, %v1321_v7  ;;  %v1396_v14 = vld [vmem:[%s1546_s12 + $0x5c] sm:$0xff] }
  0x1d   : > { %1373 = vmatmul.msk.bf16.vlgmr.msra.gmra.mxu2 %vm388_vm2, %v666_v33  ;;  %v701_v3 = vor.u32 %v700_v0, %v697_v63  ;;  %v709_v12 = vrot.slane %v707_v5, 2  ;;  %v1368_v16 = vor.u32 %v1409_v10, %v1367_v9 }
  0x1e   : > { %v693_v23 = vsel %vm649_vm3, %v683_v57, %v692_v2 }
  0x1f   : > { %v702_v6 = vsel %vm649_vm3, %v692_v2, %v701_v3  ;;  %v710_v17 = vor.u32 %v709_v12, %v706_v11  ;;  %v713_v18 = vshrl.u32 %v1368_v16, 16  ;;  %v716_v19 = vshll.u32 %v1368_v16, 16 }
  0x21   : > { %v711_v20 = vsel %vm649_vm3, %v701_v3, %v710_v17  ;;  %v715_v21 = vrot.slane %v713_v18, 1  ;;  %v718_v22 = vrot.slane %v716_v19, 2 }
  0x23   : > { %v719_v24 = vor.u32 %v718_v22, %v715_v21 }
  0x25   : > { %1290 = vmatmul.msk.bf16.gmra.mxu3 %vm388_vm2, %v1278_v38  ;;  %1284 = vmatmul.msk.bf16.gmra.mxu0 %vm388_vm2, %v1394_v39  ;;  %v720_v26 = vsel %vm649_vm3, %v710_v17, %v719_v24 }
  0x26   : > { %1328 = vmatmul.msk.bf16.gmra.mxu1 %vm388_vm2, %v1385_v40 }
  0x2d   : > { %1374 = vmatmul.msk.bf16.gmra.mxu2 %vm388_vm2, %v675_v45 }
  0x35   : > { %1333 = vmatmul.msk.bf16.vlgmr.msrb.gmra.mxu3 %vm388_vm2, %v1390_v49  ;;  %1285 = vmatmul.msk.bf16.gmra.mxu0 %vm388_vm2, %v1395_v50 }
  0x36   : > { %1329 = vmatmul.msk.bf16.gmra.mxu1 %vm388_vm2, %v1386_v51 }
  0x3d   : > { %1375 = vmatmul.msk.bf16.gmra.mxu2 %vm388_vm2, %v684_v1 }
  0x45   : > { %1334 = vmatmul.msk.bf16.gmra.mxu3 %vm388_vm2, %v1322_v13  ;;  %1286 = vmatmul.msk.bf16.gmra.mxu0 %vm388_vm2, %v1396_v14 }
  0x46   : > { %1330 = vmatmul.msk.bf16.gmra.mxu1 %vm388_vm2, %v1387_v15 }
  0x4d   : > { %1376 = vmatmul.msk.bf16.gmra.mxu2 %vm388_vm2, %v693_v23 }
  0x55   : > { %1379 = vmatmul.msk.bf16.vlgmr.msra.gmra.mxu3 %vm388_vm2, %v720_v26  ;;  %1287 = vmatmul.msk.bf16.gmra.mxu0 %vm388_vm2, %v1397_v25 }
  0x56   : > { %1331 = vmatmul.msk.bf16.gmra.mxu1 %vm388_vm2, %v1388_v27 }
  0x5d   : > { %1377 = vmatmul.msk.bf16.gmra.mxu2 %vm388_vm2, %v702_v6  ;;  %v1628_v6 = vld [vmem:[%s1864_s2] ss:$0 sm:$0xff] }
  0x65   : > { %1380 = vmatmul.msk.bf16.gmra.mxu3 %vm388_vm2, %v719_v24  ;;  %1288 = vmatmul.msk.bf16.gmra.mxu0 %vm388_vm2, %v1398_v28 }
  0x66   : > { %1332 = vmatmul.msk.bf16.gmra.mxu1 %vm388_vm2, %v1389_v29 }
  0x6d   : > { %1378 = vmatmul.msk.bf16.gmra.mxu2 %vm388_vm2, %v711_v20 }
  0x92   : > { %v429_v30 = vpop.f32.mrf.mxu0 }
  0x93   : > { %v550_v31 = vpop.f32.mrf.mxu1 }
  0x94   : > { %v551_v32 = vadd.f32 %v550_v31, %v429_v30 }
  0x98   : > { %v1607_v33 = vpop.f32.mrf.mxu3 }
  0x9a   : > { %v431_v34 = vpop.f32.mrf.mxu0 }
  0x9b   : > { %v552_v35 = vpop.f32.mrf.mxu1 }
  0x9c   : > { %v553_v4 = vadd.f32 %v552_v35, %v431_v34 }
  0xa0   : > { %v1609_v36 = vpop.f32.mrf.mxu3  ;;  %v762_v37 = vpop.f32.mrf.mxu2 }
  0xa1   : > { %v802_v38 = vadd.f32 %v762_v37, %v551_v32 }
  0xa2   : > { %v434_v39 = vpop.f32.mrf.mxu0 }
  0xa3   : > { %v555_v40 = vpop.f32.mrf.mxu1  ;;  %v1634_v15 = vadd.f32 %v1628_v6, %v802_v38 }
  0xa4   : > { %v556_v2 = vadd.f32 %v555_v40, %v434_v39 }
  0xa5   : > { %v885_v24 = vmul.f32 %v1634_v15, %v1634_v15  ;;  %v839_v35 = vsel %vm838_vm4, %v1634_v15, 0.0 }
  0xa7   : > { %v901_v40 = vsel %vm838_vm4, %v885_v24, 0.0 }
  0xa8   : > { %v1611_v41 = vpop.f32.mrf.mxu3  ;;  %v764_v42 = vpop.f32.mrf.mxu2 }
  0xa9   : > { %v803_v5 = vadd.f32 %v764_v42, %v553_v4 }
  0xaa   : > { %v436_v43 = vpop.f32.mrf.mxu0 }
  0xab   : > { %v557_v44 = vpop.f32.mrf.mxu1  ;;  %v1631_v14 = vadd.f32 %v1628_v6, %v803_v5 }
  0xac   : > { %v558_v7 = vadd.f32 %v557_v44, %v436_v43 }
  0xad   : > { %v886_v23 = vmul.f32 %v1631_v14, %v1631_v14  ;;  %v840_v25 = vsel %vm838_vm4, %v1631_v14, 0.0 }
  0xae   : > { %v841_v42 = vadd.f32 %v840_v25, %v839_v35 }
  0xaf   : > { %v902_v37 = vsel %vm838_vm4, %v886_v23, 0.0 }
  0xb0   : > { %v1613_v45 = vpop.f32.mrf.mxu3  ;;  %v767_v46 = vpop.f32.mrf.mxu2 }
  0xb1   : > { %v804_v8 = vadd.f32 %v767_v46, %v556_v2 }
  0xb2   : > { %v439_v47 = vpop.f32.mrf.mxu0 }
  0xb3   : > { %v560_v48 = vpop.f32.mrf.mxu1  ;;  %v1637_v16 = vadd.f32 %v1628_v6, %v804_v8 }
  0xb4   : > { %v561_v9 = vadd.f32 %v560_v48, %v439_v47 }
  0xb5   : > { %v887_v26 = vmul.f32 %v1637_v16, %v1637_v16  ;;  %v842_v38 = vsel %vm838_vm4, %v1637_v16, 0.0 }
  0xb7   : > { %v904_v43 = vsel %vm838_vm4, %v887_v26, 0.0 }
  0xb8   : > { %v1615_v49 = vpop.f32.mrf.mxu3  ;;  %v769_v50 = vpop.f32.mrf.mxu2 }
  0xb9   : > { %v805_v11 = vadd.f32 %v769_v50, %v558_v7 }
  0xba   : > { %v441_v51 = vpop.f32.mrf.mxu0 }
  0xbb   : > { %v562_v52 = vpop.f32.mrf.mxu1  ;;  %v1640_v20 = vadd.f32 %v1628_v6, %v805_v11 }
  0xbc   : > { %v563_v17 = vadd.f32 %v562_v52, %v441_v51 }
  0xbd   : > { %v888_v31 = vmul.f32 %v1640_v20, %v1640_v20  ;;  %v844_v44 = vsel %vm838_vm4, %v1640_v20, 0.0 }
  0xc0   : > { %v1617_v53 = vpop.f32.mrf.mxu3  ;;  %v772_v54 = vpop.f32.mrf.mxu2 }
  0xc1   : > { %v806_v18 = vadd.f32 %v772_v54, %v561_v9  ;;  %v903_v54 = vadd.f32 %v902_v37, %v901_v40  ;;  %v583_v24 = vadd.f32 %v1617_v53, %v1609_v36 }
  0xc2   : > { %v444_v55 = vpop.f32.mrf.mxu0 }
  0xc3   : > { %v565_v56 = vpop.f32.mrf.mxu1  ;;  %v1653_v27 = vadd.f32 %v1628_v6, %v806_v18 }
  0xc4   : > { %v566_v19 = vadd.f32 %v565_v56, %v444_v55  ;;  %v843_v55 = vadd.f32 %v842_v38, %v841_v42  ;;  %v906_v56 = vsel %vm838_vm4, %v888_v31, 0.0 }
  0xc5   : > { %v889_v48 = vmul.f32 %v1653_v27, %v1653_v27 }
  0xc7   : > { %v908_v4 = vsel %vm838_vm4, %v889_v48, 0.0 }
  0xc8   : > { %v1619_v57 = vpop.f32.mrf.mxu3  ;;  %v774_v58 = vpop.f32.mrf.mxu2 }
  0xc9   : > { %v807_v21 = vadd.f32 %v774_v58, %v563_v17 }
  0xca   : > { %v446_v59 = vpop.f32.mrf.mxu0 }
  0xcb   : > { %v567_v60 = vpop.f32.mrf.mxu1  ;;  %v1658_v32 = vadd.f32 %v1628_v6, %v807_v21  ;;  %v581_v21 = vadd.f32 %v1615_v49, %v1607_v33  ;;  %v586_v33 = vadd.f32 %v1619_v57, %v1611_v41 }
  0xcc   : > { %v568_v28 = vadd.f32 %v567_v60, %v446_v59  ;;  %v846_v59 = vsel %vm838_vm4, %v1653_v27, 0.0 }
  0xcd   : > { %v890_v58 = vmul.f32 %v1658_v32, %v1658_v32  ;;  %v848_v5 = vsel %vm838_vm4, %v1658_v32, 0.0 }
  0xcf   : > { %v910_v11 = vsel %vm838_vm4, %v890_v58, 0.0 }
  0xd0   : > { %v777_v61 = vpop.f32.mrf.mxu2  ;;  %v1621_v62 = vpop.f32.mrf.mxu3 }
  0xd1   : > { %v808_v29 = vadd.f32 %v777_v61, %v566_v19  ;;  %v588_v40 = vadd.f32 %v1621_v62, %v1613_v45  ;;  %v1473_v45 = vmov 121.0  }
  0xd2   : > { %v449_v63 = vpop.f32.mrf.mxu0  ;;  %1444 = vrcp.f32 %v1473_v45 }
  0xd3   : > { %v570_v0 = vpop.f32.mrf.mxu1  ;;  %v1672_v50 = vadd.f32 %v1628_v6, %v808_v29 }
  0xd4   : > { %v571_v30 = vadd.f32 %v570_v0, %v449_v63  ;;  %v905_v0 = vadd.f32 %v904_v43, %v903_v54 }
  0xd5   : > { %v891_v7 = vmul.f32 %v1672_v50, %v1672_v50 }
  0xd6   : > { %v907_v9 = vadd.f32 %v906_v56, %v905_v0 }
  0xd7   : > { %v912_v26 = vsel %vm838_vm4, %v891_v7, 0.0 }
  0xd8   : > { %v779_v1 = vpop.f32.mrf.mxu2  ;;  %v1623_v3 = vpop.f32.mrf.mxu3  ;;  %v909_v23 = vadd.f32 %v908_v4, %v907_v9 }
  0xd9   : > { %v809_v39 = vadd.f32 %v779_v1, %v568_v28  ;;  %v845_v1 = vadd.f32 %v844_v44, %v843_v55 }
  0xda   : > { %v451_v10 = vpop.f32.mrf.mxu0  ;;  %v911_v31 = vadd.f32 %v910_v11, %v909_v23 }
  0xdb   : > { %v572_v12 = vpop.f32.mrf.mxu1  ;;  %v1680_v60 = vadd.f32 %v1628_v6, %v809_v39 }
  0xdc   : > { %v573_v51 = vadd.f32 %v572_v12, %v451_v10  ;;  %v847_v10 = vadd.f32 %v846_v59, %v845_v1  ;;  %v913_v39 = vadd.f32 %v912_v26, %v911_v31 }
  0xdd   : > { %v892_v17 = vmul.f32 %v1680_v60, %v1680_v60  ;;  %v852_v28 = vsel %vm838_vm4, %v1680_v60, 0.0 }
  0xde   : > { %v849_v25 = vadd.f32 %v848_v5, %v847_v10  ;;  %v1445_v10 = vpop.eup %1444 }
  0xdf   : > { %v914_v35 = vsel %vm838_vm4, %v892_v17, 0.0  ;;  %vm882_vm6 = vweird.f32 %v1445_v10 }
  0xe0   : > { %v782_v13 = vpop.f32.mrf.mxu2  ;;  %v1642_v22 = vpop.f32.mrf.mxu3 }
  0xe1   : > { %v810_v52 = vadd.f32 %v782_v13, %v571_v30  ;;  %v850_v13 = vsel %vm838_vm4, %v1672_v50, 0.0  ;;  %v815_v41 = vadd.f32 %v1642_v22, %v583_v24 }
  0xe2   : > { %v454_v46 = vpop.f32.mrf.mxu0  ;;  %v851_v49 = vadd.f32 %v850_v13, %v849_v25 }
  0xe3   : > { %v575_v47 = vpop.f32.mrf.mxu1  ;;  %v1688_v8 = vadd.f32 %v1628_v6, %v810_v52  ;;  %v1733_v59 = vadd.f32 %v1628_v6, %v815_v41 }
  0xe4   : > { %v576_v61 = vadd.f32 %v575_v47, %v454_v46  ;;  %v853_v42 = vadd.f32 %v852_v28, %v851_v49  ;;  %v915_v46 = vadd.f32 %v914_v35, %v913_v39 }
  0xe5   : > { %v893_v29 = vmul.f32 %v1688_v8, %v1688_v8  ;;  %v854_v37 = vsel %vm838_vm4, %v1688_v8, 0.0  ;;  %v898_v17 = vmul.f32 %v1733_v59, %v1733_v59  ;;  %v864_v26 = vsel %vm838_vm4, %v1733_v59, 0.0 }
  0xe6   : > { %v855_v48 = vadd.f32 %v854_v37, %v853_v42 }
  0xe7   : > { %v916_v57 = vsel %vm838_vm4, %v893_v29, 0.0  ;;  %v878_v29 = vmul.f32 121.0, %v1445_v10  ;;  %v926_v49 = vsel %vm838_vm4, %v898_v17, 0.0 }
  0xe8   : > { %v784_v34 = vpop.f32.mrf.mxu2  ;;  %v797_v2 = vpop.f32.mrf.mxu3  ;;  %v917_v56 = vadd.f32 %v916_v57, %v915_v46 }
  0xe9   : > { %v811_v63 = vadd.f32 %v784_v34, %v573_v51  ;;  %v814_v34 = vadd.f32 %v1623_v3, %v581_v21  ;;  %v816_v22 = vadd.f32 %v797_v2, %v586_v33 }
  0xea   : > { %v456_v36 = vpop.f32.mrf.mxu0 }
  0xeb   : > { %v1696_v18 = vadd.f32 %v1628_v6, %v811_v63  ;;  %v577_v53 = vpop.f32.mrf.mxu1  ;;  %v1727_v47 = vadd.f32 %v1628_v6, %v814_v34  ;;  %v1742_v5 = vadd.f32 %v1628_v6, %v816_v22 }
  0xec   : > { %v578_v43 = vadd.f32 %v577_v53, %v456_v36 }
  0xed   : > { %v894_v38 = vmul.f32 %v1696_v18, %v1696_v18  ;;  %v856_v3 = vsel %vm838_vm4, %v1696_v18, 0.0  ;;  %v897_v2 = vmul.f32 %v1727_v47, %v1727_v47  ;;  %v862_v13 = vsel %vm838_vm4, %v1727_v47, 0.0 }
  0xee   : > { %v857_v58 = vadd.f32 %v856_v3, %v855_v48  ;;  %v899_v28 = vmul.f32 %v1742_v5, %v1742_v5 }
  0xef   : > { %v918_v62 = vsel %vm838_vm4, %v894_v38, 0.0  ;;  %v924_v25 = vsel %vm838_vm4, %v897_v2, 0.0  ;;  %v879_v38 = vsub.f32 1.0, %v878_v29 }
  0xf0   : > { %v787_v12 = vpop.f32.mrf.mxu2  ;;  %v799_v51 = vpop.f32.mrf.mxu3  ;;  %v919_v1 = vadd.f32 %v918_v62, %v917_v56  ;;  %v928_v35 = vsel %vm838_vm4, %v899_v28, 0.0 }
  0xf1   : > { %v812_v19 = vadd.f32 %v787_v12, %v576_v61  ;;  %v817_v63 = vadd.f32 %v799_v51, %v588_v40  ;;  %v880_v3 = vmul.f32 %v1445_v10, %v879_v38 }
  0xf3   : > { %v1708_v30 = vadd.f32 %v1628_v6, %v812_v19  ;;  %v1753_v19 = vadd.f32 %v1628_v6, %v817_v63  ;;  %v881_v51 = vadd.f32 %v1445_v10, %v880_v3 }
  0xf5   : > { %v895_v44 = vmul.f32 %v1708_v30, %v1708_v30  ;;  %v858_v54 = vsel %vm838_vm4, %v1708_v30, 0.0  ;;  %v900_v34 = vmul.f32 %v1753_v19, %v1753_v19  ;;  %v869_v37 = vsel %vm868_vm5, %v1753_v19, 0.0 }
  0xf6   : > { %v859_v4 = vadd.f32 %v858_v54, %v857_v58  ;;  %v883_v54 = vsel %vm882_vm6, %v1445_v10, %v881_v51 }
  0xf7   : > { %v920_v61 = vsel %vm838_vm4, %v895_v44, 0.0  ;;  %v930_v42 = vsel %vm868_vm5, %v900_v34, 0.0 }
  0xf8   : > { %v789_v52 = vpop.f32.mrf.mxu2  ;;  %v921_v11 = vadd.f32 %v920_v61, %v919_v1 }
  0xf9   : > { %v813_v55 = vadd.f32 %v789_v52, %v578_v43 }
  0xfb   : > { %v1737_v0 = vadd.f32 %v1628_v6, %v813_v55  ;;  %v866_v6 = vsel %vm838_vm4, %v1742_v5, 0.0 }
  0xfd   : > { %v860_v7 = vsel %vm838_vm4, %v1737_v0, 0.0  ;;  %v896_v9 = vmul.f32 %v1737_v0, %v1737_v0 }
  0xfe   : > { %v861_v12 = vadd.f32 %v860_v7, %v859_v4 }
  0xff   : > { %v922_v21 = vsel %vm838_vm4, %v896_v9, 0.0 }
 0x100   : > { %v863_v23 = vadd.f32 %v862_v13, %v861_v12  ;;  %v923_v24 = vadd.f32 %v922_v21, %v921_v11 }
 0x102   : > { %v865_v31 = vadd.f32 %v864_v26, %v863_v23  ;;  %v925_v33 = vadd.f32 %v924_v25, %v923_v24 }
 0x104   : > { %v867_v36 = vadd.f32 %v866_v6, %v865_v31  ;;  %v927_v53 = vadd.f32 %v926_v49, %v925_v33 }
 0x106   : > { %v870_v39 = vadd.f32 %v869_v37, %v867_v36  ;;  %v929_v40 = vadd.f32 %v928_v35, %v927_v53 }
 0x108   : > { %v871_v41 = vrot.slane %v870_v39, 4  ;;  %v931_v57 = vadd.f32 %v930_v42, %v929_v40  ;;  %v1792_v42 = vld [vmem:[%s1866_s4] ss:$0 sm:$0xff] }
 0x10a   : > { %v872_v43 = vadd.f32 %v871_v41, %v870_v39  ;;  %v932_v44 = vrot.slane %v931_v57, 4 }
 0x10c   : > { %v873_v46 = vrot.slane %v872_v43, 2  ;;  %v933_v48 = vadd.f32 %v932_v44, %v931_v57 }
 0x10e   : > { %v874_v52 = vadd.f32 %v873_v46, %v872_v43  ;;  %v934_v45 = vrot.slane %v933_v48, 2 }
 0x110   : > { %v875_v62 = vrot.slane %v874_v52, 1  ;;  %v935_v22 = vadd.f32 %v934_v45, %v933_v48 }
 0x112   : > { %v876_v55 = vadd.f32 %v875_v62, %v874_v52  ;;  %v936_v56 = vrot.slane %v935_v22, 1 }
 0x114   : > { %v884_v58 = vmul.f32 %v883_v54, %v876_v55  ;;  %v937_v61 = vadd.f32 %v936_v56, %v935_v22 }
 0x116   : > { %v938_v63 = vmul.f32 %v937_v61, %v883_v54  ;;  %v939_v1 = vmul.f32 %v884_v58, %v884_v58  ;;  %v946_v4 = vsub.f32 %v1658_v32, %v884_v58  ;;  %v947_v7 = vsub.f32 %v1672_v50, %v884_v58 }
 0x117   : > { %v953_v9 = vsub.f32 %v1727_v47, %v884_v58  ;;  %v954_v11 = vsub.f32 %v1733_v59, %v884_v58  ;;  %v955_v12 = vsub.f32 %v1742_v5, %v884_v58  ;;  %v941_v25 = vsub.f32 %v1634_v15, %v884_v58 }
 0x118   : > { %v940_v2 = vsub.f32 %v938_v63, %v939_v1  ;;  %v942_v32 = vsub.f32 %v1631_v14, %v884_v58  ;;  %v943_v50 = vsub.f32 %v1637_v16, %v884_v58  ;;  %v944_v47 = vsub.f32 %v1640_v20, %v884_v58 }
 0x119   : > { %v945_v59 = vsub.f32 %v1653_v27, %v884_v58  ;;  %v948_v5 = vsub.f32 %v1680_v60, %v884_v58  ;;  %v949_v28 = vsub.f32 %v1688_v8, %v884_v58  ;;  %v950_v29 = vsub.f32 %v1696_v18, %v884_v58 }
 0x11a   : > { %v957_v13 = vadd.f32 1e-05, %v940_v2  ;;  %v951_v31 = vsub.f32 %v1708_v30, %v884_v58  ;;  %v952_v15 = vsub.f32 %v1737_v0, %v884_v58  ;;  %v956_v14 = vsub.f32 %v1753_v19, %v884_v58  ;;  %v1442_v0 = vld [vmem:[%s1865_s3] ss:$0 sm:$0xff] }
 0x11c   : > { %1446 = vrsqrt.f32 %v957_v13  ;;  %vm964_vm8 = vweird.f32 %v957_v13 }
 0x122   : > { %v1447_v10 = vpop.eup %1446 }
 0x123   : > { %v959_v17 = vmul.f32 %v1447_v10, %v957_v13  ;;  %vm965_vm7 = vweird.f32 %v1447_v10 }
 0x124   : > { %vm966_vm9 = vmor %vm964_vm8, %vm965_vm7 }
 0x125   : > { %v960_v21 = vmul.f32 %v1447_v10, %v959_v17 }
 0x127   : > { %v961_v23 = vmul.f32 0.5, %v960_v21 }
 0x129   : > { %v962_v24 = vsub.f32 1.5, %v961_v23 }
 0x12b   : > { %v963_v26 = vmul.f32 %v1447_v10, %v962_v24 }
 0x12d   : > { %v967_v16 = vsel %vm966_vm9, %v1447_v10, %v963_v26 }
 0x12e   : > { %v968_v33 = vmul.f32 %v967_v16, %v941_v25  ;;  %v969_v20 = vmul.f32 %v967_v16, %v942_v32  ;;  %v970_v49 = vmul.f32 %v967_v16, %v943_v50  ;;  %v971_v6 = vmul.f32 %v967_v16, %v944_v47 }
 0x12f   : > { %v972_v34 = vmul.f32 %v967_v16, %v945_v59  ;;  %v973_v27 = vmul.f32 %v967_v16, %v946_v4  ;;  %v974_v36 = vmul.f32 %v967_v16, %v947_v7  ;;  %v975_v60 = vmul.f32 %v967_v16, %v948_v5 }
 0x130   : > { %v976_v53 = vmul.f32 %v967_v16, %v949_v28  ;;  %v977_v8 = vmul.f32 %v967_v16, %v950_v29  ;;  %v978_v35 = vmul.f32 %v967_v16, %v951_v31  ;;  %v979_v18 = vmul.f32 %v967_v16, %v952_v15 }
 0x131   : > { %v980_v37 = vmul.f32 %v967_v16, %v953_v9  ;;  %v981_v38 = vmul.f32 %v967_v16, %v954_v11  ;;  %v982_v30 = vmul.f32 %v967_v16, %v955_v12  ;;  %v983_v39 = vmul.f32 %v967_v16, %v956_v14 }
 0x132   : > { %v988_v19 = vmul.f32 %v1442_v0, %v968_v33  ;;  %v989_v40 = vmul.f32 %v1442_v0, %v969_v20  ;;  %v990_v41 = vmul.f32 %v1442_v0, %v970_v49  ;;  %v991_v57 = vmul.f32 %v1442_v0, %v971_v6 }
 0x133   : > { %v992_v3 = vmul.f32 %v1442_v0, %v972_v34  ;;  %v993_v43 = vmul.f32 %v1442_v0, %v973_v27  ;;  %v994_v48 = vmul.f32 %v1442_v0, %v974_v36  ;;  %v995_v51 = vmul.f32 %v1442_v0, %v975_v60 }
 0x134   : > { %v1008_v44 = vadd.f32 %v1792_v42, %v988_v19  ;;  %v1009_v46 = vadd.f32 %v1792_v42, %v989_v40  ;;  %v1010_v52 = vadd.f32 %v1792_v42, %v990_v41  ;;  %v996_v45 = vmul.f32 %v1442_v0, %v976_v53 }
 0x135   : > { %v997_v62 = vmul.f32 %v1442_v0, %v977_v8  ;;  %v998_v22 = vmul.f32 %v1442_v0, %v978_v35  ;;  %v1011_v54 = vadd.f32 %v1792_v42, %v991_v57  ;;  %v999_v55 = vmul.f32 %v1442_v0, %v979_v18 }
 0x136   : > { %v1000_v56 = vmul.f32 %v1442_v0, %v980_v37  ;;  %v1001_v58 = vmul.f32 %v1442_v0, %v981_v38  ;;  %v1012_v61 = vadd.f32 %v1792_v42, %v992_v3  ;;  %v1002_v63 = vmul.f32 %v1442_v0, %v982_v30 }
 0x137   : > { %v1013_v1 = vadd.f32 %v1792_v42, %v993_v43  ;;  %vm1024_vm10 = vcmp.gt.f32.partialorder %v1008_v44, 0.0  ;;  %vm1025_vm11 = vcmp.gt.f32.partialorder %v1009_v46, 0.0  ;;  %v1014_v4 = vadd.f32 %v1792_v42, %v994_v48 }
 0x138   : > { %v1040_v2 = vmul.f32 0.01, %v1008_v44  ;;  %v1041_v7 = vmul.f32 0.01, %v1009_v46  ;;  %v1042_v9 = vmul.f32 0.01, %v1010_v52  ;;  %v1003_v11 = vmul.f32 %v1442_v0, %v983_v39 }
 0x139   : > { %v1015_v12 = vadd.f32 %v1792_v42, %v995_v51  ;;  %vm1026_vm12 = vcmp.gt.f32.partialorder %v1010_v52, 0.0  ;;  %v1043_v13 = vmul.f32 0.01, %v1011_v54  ;;  %v1016_v10 = vadd.f32 %v1792_v42, %v996_v45 }
 0x13a   : > { %vm1027_vm13 = vcmp.gt.f32.partialorder %v1011_v54, 0.0  ;;  %v1044_v17 = vmul.f32 0.01, %v1012_v61  ;;  %v1056_v21 = vsel %vm1024_vm10, %v1008_v44, %v1040_v2  ;;  %v1017_v23 = vadd.f32 %v1792_v42, %v997_v62 }
 0x13b   : > { %vm1028_vm14 = vcmp.gt.f32.partialorder %v1012_v61, 0.0  ;;  %v1045_v24 = vmul.f32 0.01, %v1013_v1  ;;  %v1057_v25 = vsel %vm1025_vm11, %v1009_v46, %v1041_v7  ;;  %v1018_v32 = vadd.f32 %v1792_v42, %v998_v22  ;;  %1072 = vst.msk [vmem:[%s1806_s26] sm:$0xff] %vm838_vm4, %v1056_v21 }
 0x13c   : > { %vm1029_vm15 = vcmp.gt.f32.partialorder %v1013_v1, 0.0  ;;  %v1046_v50 = vmul.f32 0.01, %v1014_v4  ;;  %v1058_v47 = vsel %vm1026_vm12, %v1010_v52, %v1042_v9  ;;  %v1019_v26 = vadd.f32 %v1792_v42, %v999_v55  ;;  %1073 = vst.msk [vmem:[%s1806_s26 + $0x8] sm:$0xff] %vm838_vm4, %v1057_v25 }
 0x13d   : > { %vm1030_vm0 = vcmp.gt.f32.partialorder %v1014_v4, 0.0  ;;  %v1047_v59 = vmul.f32 0.01, %v1015_v12  ;;  %v1059_v5 = vsel %vm1027_vm13, %v1011_v54, %v1043_v13  ;;  %v1020_v28 = vadd.f32 %v1792_v42, %v1000_v56  ;;  %1074 = vst.msk [vmem:[%s1806_s26 + $0x10] sm:$0xff] %vm838_vm4, %v1058_v47 }
 0x13e   : > { %vm1031_vm1 = vcmp.gt.f32.partialorder %v1015_v12, 0.0  ;;  %v1048_v29 = vmul.f32 0.01, %v1016_v10  ;;  %v1060_v31 = vsel %vm1028_vm14, %v1012_v61, %v1044_v17  ;;  %v1021_v15 = vadd.f32 %v1792_v42, %v1001_v58  ;;  %1075 = vst.msk [vmem:[%s1806_s26 + $0x18] sm:$0xff] %vm838_vm4, %v1059_v5 }
 0x13f   : > { %vm1032_vm2 = vcmp.gt.f32.partialorder %v1016_v10, 0.0  ;;  %v1049_v14 = vmul.f32 0.01, %v1017_v23  ;;  %v1061_v16 = vsel %vm1029_vm15, %v1013_v1, %v1045_v24  ;;  %v1022_v33 = vadd.f32 %v1792_v42, %v1002_v63  ;;  %1076 = vst.msk [vmem:[%s1806_s26 + $0x20] sm:$0xff] %vm838_vm4, %v1060_v31 }
 0x140   : > { %vm1033_vm3 = vcmp.gt.f32.partialorder %v1017_v23, 0.0  ;;  %v1050_v20 = vmul.f32 0.01, %v1018_v32  ;;  %v1062_v49 = vsel %vm1030_vm0, %v1014_v4, %v1046_v50  ;;  %v1023_v6 = vadd.f32 %v1792_v42, %v1003_v11  ;;  %1077 = vst.msk [vmem:[%s1806_s26 + $0x28] sm:$0xff] %vm838_vm4, %v1061_v16 }
 0x141   : > { %vm1034_vm6 = vcmp.gt.f32.partialorder %v1018_v32, 0.0  ;;  %v1051_v34 = vmul.f32 0.01, %v1019_v26  ;;  %v1063_v27 = vsel %vm1031_vm1, %v1015_v12, %v1047_v59  ;;  %vm1035_vm7 = vcmp.gt.f32.partialorder %v1019_v26, 0.0  ;;  %1078 = vst.msk [vmem:[%s1806_s26 + $0x30] sm:$0xff] %vm838_vm4, %v1062_v49 }
 0x142   : > { %v1052_v36 = vmul.f32 0.01, %v1020_v28  ;;  %v1064_v60 = vsel %vm1032_vm2, %v1016_v10, %v1048_v29  ;;  %vm1036_vm8 = vcmp.gt.f32.partialorder %v1020_v28, 0.0  ;;  %v1053_v53 = vmul.f32 0.01, %v1021_v15  ;;  %1079 = vst.msk [vmem:[%s1806_s26 + $0x38] sm:$0xff] %vm838_vm4, %v1063_v27 }
 0x143   : > { %v1065_v8 = vsel %vm1033_vm3, %v1017_v23, %v1049_v14  ;;  %vm1037_vm9 = vcmp.gt.f32.partialorder %v1021_v15, 0.0  ;;  %v1054_v35 = vmul.f32 0.01, %v1022_v33  ;;  %v1066_v18 = vsel %vm1034_vm6, %v1018_v32, %v1050_v20  ;;  %1080 = vst.msk [vmem:[%s1806_s26 + $0x40] sm:$0xff] %vm838_vm4, %v1064_v60 }
 0x144   : > { %vm1038_vm10 = vcmp.gt.f32.partialorder %v1022_v33, 0.0  ;;  %v1055_v37 = vmul.f32 0.01, %v1023_v6  ;;  %v1067_v38 = vsel %vm1035_vm7, %v1019_v26, %v1051_v34  ;;  %vm1039_vm11 = vcmp.gt.f32.partialorder %v1023_v6, 0.0  ;;  %1081 = vst.msk [vmem:[%s1806_s26 + $0x48] sm:$0xff] %vm838_vm4, %v1065_v8 }
 0x145   : > { %v1068_v30 = vsel %vm1036_vm8, %v1020_v28, %v1052_v36  ;;  %v1069_v39 = vsel %vm1037_vm9, %v1021_v15, %v1053_v53  ;;  %1082 = vst.msk [vmem:[%s1806_s26 + $0x50] sm:$0xff] %vm838_vm4, %v1066_v18  ;;  %v1070_v0 = vsel %vm1038_vm10, %v1022_v33, %v1054_v35 }
 0x146   : > { %1083 = vst.msk [vmem:[%s1806_s26 + $0x58] sm:$0xff] %vm838_vm4, %v1067_v38  ;;  %v1071_v19 = vsel %vm1039_vm11, %v1023_v6, %v1055_v37 }
 0x147   : > { %1084 = vst.msk [vmem:[%s1806_s26 + $0x60] sm:$0xff] %vm838_vm4, %v1068_v30 }
 0x148   : > { %1085 = vst.msk [vmem:[%s1806_s26 + $0x68] sm:$0xff] %vm838_vm4, %v1069_v39 }
 0x149   : > { %1086 = vst.msk [vmem:[%s1806_s26 + $0x70] sm:$0xff] %vm838_vm4, %v1070_v0 }
 0x14a   : > { %1087 = vst.msk [vmem:[%s1806_s26 + $0x78] sm:$0x1] %vm868_vm5, %v1071_v19 }
 0x14b PF: > { %s15_s20 = sadd.s32 1, %s1470_s20   ;;  %s1868_s18 = smov %s1466_s19 }
 0x14c   : > { %p12_p5 = scmp.ge.s32.totalorder %s15_s20, 4   ;;  %s1869_s19 = smov %s1871_s21 }
 0x14e   :  { %14 = sbr.rel (!%p12_p5) target bundleno = 2 (0x2), region = 85 }

</bundles_post_ra>
